<compile_context>
chip_gen: v6e
topology: v6e:2x2x1
jax: 0.10.0
libtpu: 0.0.40
codegen_flags: <defaults>
</compile_context>

<pallas_src>
import functools

import jax
import jax.numpy as jnp
from jax import lax
from jax.experimental import pallas as pl
from jax.experimental.pallas import tpu as pltpu


def _round_up(x, m):
    return ((x + m - 1) // m) * m


def _tblr2bbox_kernel(p_ref, t_ref, o_ref, *, normalizer):
    # p_ref/t_ref/o_ref: (block_rows, 128); lane l holds coordinate (l % 4)
    # of box (32*row + l // 4).
    #   priors lanes per box: [x0,   y0,     x1,   y1   ]
    #   tblr   lanes per box: [top,  bottom, left, right]
    #   output lanes per box: [xmin, ymin,   xmax, ymax ]
    p = p_ref[...].astype(jnp.float32)
    t = t_ref[...].astype(jnp.float32)
    lanes = p.shape[-1]
    lane_axis = p.ndim - 1

    # Lane-pattern masks on a single (1, lanes) tile; selects broadcast them.
    c = lax.broadcasted_iota(jnp.int32, (1, lanes), dimension=1) & 3
    is_lo = c < 2            # output lanes xmin/ymin
    is_even = (c & 1) == 0   # output lanes xmin/xmax (x coordinates)

    def rollL(v, s):
        # Only same-box sources are ever selected, so no cross-group wrap.
        return pltpu.roll(v, s % lanes, axis=lane_axis)

    # "other" prior coordinate per output lane: [x1, y1, x0, y0]
    other = jnp.where(is_lo, rollL(p, -2), rollL(p, 2))

    # tblr permuted to output order: [left, top, right, bottom]
    t_perm = jnp.where(is_even,
                       jnp.where(is_lo, rollL(t, -2), rollL(t, -1)),
                       jnp.where(is_lo, rollL(t, 1), rollL(t, 2)))

    if isinstance(normalizer, (int, float)):
        loc = t_perm * normalizer
    else:  # length-4 per-coordinate normalizer (t, b, l, r), permuted
        nt_, nb_, nl_, nr_ = (float(v) for v in normalizer)
        nvec = jnp.where(is_even, jnp.where(is_lo, nl_, nr_),
                         jnp.where(is_lo, nt_, nb_))
        loc = t_perm * nvec

    # center -/+ loc*wh  ==  p*(0.5 + loc) + other*(0.5 - loc)
    a = loc + 0.5
    o_ref[...] = (p * a + other * (1.0 - a)).astype(o_ref.dtype)


def tblr2bboxes_pallas(priors, tblr, normalizer=4.0, normalize_by_wh=True,
                       max_shape=None):
    """priors: (n, 4), tblr: (n, 4) -> boxes (n, 4)."""
    assert priors.shape == tblr.shape and priors.shape[-1] == 4
    assert priors.dtype == tblr.dtype
    assert normalize_by_wh, "only normalize_by_wh=True is implemented"
    # TODO(synk): max_shape clamping path not implemented (module forward uses max_shape=None).
    assert max_shape is None

    n = priors.shape[0]
    dtype = priors.dtype
    total = 4 * n

    LANES = 128                  # last dim == one vreg: single-vreg rolls
    MAX_BLOCK_ROWS = 4096        # 2 MiB/array/block; ~12 MiB double-buffered
    rows = pl.cdiv(total, LANES)

    # Copy-free lane-dense view when 4*n is a multiple of 128 (n % 32 == 0).
    p_flat = priors.reshape(total)
    t_flat = tblr.reshape(total)
    padded = rows * LANES
    if padded != total:
        # Ragged tail (< 32 boxes): pay one pad/slice pass.
        # TODO(synk): a manual tail DMA (pl.ANY + make_async_copy) would avoid this copy.
        p_flat = jnp.pad(p_flat, (0, padded - total))
        t_flat = jnp.pad(t_flat, (0, padded - total))
    p2 = p_flat.reshape(rows, LANES)
    t2 = t_flat.reshape(rows, LANES)

    if rows <= 16:
        block_rows = rows                      # single block == full dim
    else:
        # >= 2 blocks (v7x megacore), each a multiple of 8 sublanes.
        block_rows = min(MAX_BLOCK_ROWS, _round_up(pl.cdiv(rows, 2), 8))
    grid = pl.cdiv(rows, block_rows)           # partial last block is masked

    norm_arg = (float(normalizer) if isinstance(normalizer, (int, float))
                else tuple(float(v) for v in normalizer))

    out2 = pl.pallas_call(
        functools.partial(_tblr2bbox_kernel, normalizer=norm_arg),
        out_shape=jax.ShapeDtypeStruct((rows, LANES), dtype),
        grid=(grid,),
        in_specs=[
            pl.BlockSpec((block_rows, LANES), lambda i: (i, 0)),
            pl.BlockSpec((block_rows, LANES), lambda i: (i, 0)),
        ],
        out_specs=pl.BlockSpec((block_rows, LANES), lambda i: (i, 0)),
        compiler_params=pltpu.CompilerParams(
            dimension_semantics=("parallel",)),
    )(p2, t2)

    out_flat = out2.reshape(padded)
    if padded != total:
        out_flat = out_flat[:total]
    return out_flat.reshape(n, 4)


def tblr2bboxes_ref(priors, tblr, normalizer=4.0):
    """Pure-JAX reference matching the PyTorch semantics (max_shape=None)."""
    if isinstance(normalizer, (int, float)):
        loc = tblr * normalizer
    else:
        loc = tblr * jnp.asarray(normalizer, dtype=tblr.dtype)
    centers = (priors[:, 0:2] + priors[:, 2:4]) / 2
    wh = priors[:, 2:4] - priors[:, 0:2]
    w = wh[:, 0:1]
    h = wh[:, 1:2]
    top = loc[:, 0:1] * h
    bottom = loc[:, 1:2] * h
    left = loc[:, 2:3] * w
    right = loc[:, 3:4] * w
    xmin = centers[:, 0:1] - left
    xmax = centers[:, 0:1] + right
    ymin = centers[:, 1:2] - top
    ymax = centers[:, 1:2] + bottom
    return jnp.concatenate([xmin, ymin, xmax, ymax], axis=1)


if __name__ == "__main__":
    key = jax.random.PRNGKey(0)

    def make_inputs(k, n):
        k1, k2, k3 = jax.random.split(k, 3)
        xy0 = jax.random.uniform(k1, (n, 2), jnp.float32) * 10.0
        wh = jax.random.uniform(k2, (n, 2), jnp.float32) * 5.0 + 1.0
        priors = jnp.concatenate([xy0, xy0 + wh], axis=1)        # (n, 4)
        tblr = jax.random.normal(k3, (n, 4), jnp.float32) * 0.5  # (n, 4)
        return priors, tblr

    ok = True
    # 256: aligned, single block; 300: ragged tail (pad path);
    # 800: aligned, 2 grid steps with a masked partial last block;
    # 1024: aligned, 2 full grid steps (megacore path).
    for n in (256, 300, 800, 1024):
        key, sub = jax.random.split(key)
        priors, tblr = make_inputs(sub, n)
        boxes = jax.block_until_ready(tblr2bboxes_pallas(priors, tblr))
        ref = tblr2bboxes_ref(priors, tblr)
        ok &= boxes.shape == (n, 4)
        ok &= bool(jnp.allclose(boxes, ref, atol=1e-5, rtol=1e-5))

    # Length-4 per-coordinate normalizer path.
    key, sub = jax.random.split(key)
    priors, tblr = make_inputs(sub, 256)
    nrm = (1.0, 2.0, 3.0, 4.0)
    boxes = jax.block_until_ready(
        tblr2bboxes_pallas(priors, tblr, normalizer=nrm))
    ref = tblr2bboxes_ref(priors, tblr, normalizer=nrm)
    ok &= bool(jnp.allclose(boxes, ref, atol=1e-5, rtol=1e-5))

    assert ok
    print("KERNEL_OK")
</pallas_src>

<mosaic_0001>
module attributes {stable_mosaic.version = 11 : i64} {
  func.func @_tblr2bbox_kernel(%arg0: i32, %arg1: memref<8x128xf32, #tpu.memory_space<vmem>>, %arg2: memref<8x128xf32, #tpu.memory_space<vmem>>, %arg3: memref<8x128xf32, #tpu.memory_space<vmem>>) attributes {dimension_semantics = [#tpu.dimension_semantics<parallel>], iteration_bounds = array<i64: 1>, scalar_prefetch = 0 : i64, scratch_operands = 0 : i64, tpu.core_type = #tpu.core_type<tc>, window_params = [{transform_indices = @transform_0, window_bounds = array<i64: 8, 128>}, {transform_indices = @transform_1, window_bounds = array<i64: 8, 128>}, {transform_indices = @transform_2, window_bounds = array<i64: 8, 128>}]} {
    %c0 = arith.constant 0 : index
    %c0_0 = arith.constant 0 : index
    %0 = vector.load %arg1[%c0, %c0_0] : memref<8x128xf32, #tpu.memory_space<vmem>>, vector<8x128xf32>
    %c0_1 = arith.constant 0 : index
    %c0_2 = arith.constant 0 : index
    %1 = vector.load %arg2[%c0_1, %c0_2] : memref<8x128xf32, #tpu.memory_space<vmem>>, vector<8x128xf32>
    %2 = tpu.iota {dimensions = array<i32: 1>} : vector<1x128xi32>
    %c3_i32 = arith.constant 3 : i32
    %3 = vector.broadcast %c3_i32 : i32 to vector<1x128xi32>
    %4 = arith.andi %2, %3 : vector<1x128xi32>
    %c2_i32 = arith.constant 2 : i32
    %5 = vector.broadcast %c2_i32 : i32 to vector<1x128xi32>
    %6 = arith.cmpi slt, %4, %5 : vector<1x128xi32>
    %c1_i32 = arith.constant 1 : i32
    %7 = vector.broadcast %c1_i32 : i32 to vector<1x128xi32>
    %8 = arith.andi %4, %7 : vector<1x128xi32>
    %c0_i32 = arith.constant 0 : i32
    %9 = vector.broadcast %c0_i32 : i32 to vector<1x128xi32>
    %10 = arith.cmpi eq, %8, %9 : vector<1x128xi32>
    %c126_i32 = arith.constant 126 : i32
    %11 = tpu.dynamic_rotate %0 by %c126_i32 dim 1 : vector<8x128xf32>, i32 -> vector<8x128xf32>
    %c2_i32_3 = arith.constant 2 : i32
    %12 = tpu.dynamic_rotate %0 by %c2_i32_3 dim 1 : vector<8x128xf32>, i32 -> vector<8x128xf32>
    %13 = vector.shape_cast %6 : vector<1x128xi1> to vector<1x128xi1>
    %14 = vector.broadcast %13 : vector<1x128xi1> to vector<8x128xi1>
    %15 = arith.select %14, %11, %12 : vector<8x128xi1>, vector<8x128xf32>
    %c126_i32_4 = arith.constant 126 : i32
    %16 = tpu.dynamic_rotate %1 by %c126_i32_4 dim 1 : vector<8x128xf32>, i32 -> vector<8x128xf32>
    %c127_i32 = arith.constant 127 : i32
    %17 = tpu.dynamic_rotate %1 by %c127_i32 dim 1 : vector<8x128xf32>, i32 -> vector<8x128xf32>
    %18 = vector.shape_cast %6 : vector<1x128xi1> to vector<1x128xi1>
    %19 = vector.broadcast %18 : vector<1x128xi1> to vector<8x128xi1>
    %20 = arith.select %19, %16, %17 : vector<8x128xi1>, vector<8x128xf32>
    %c1_i32_5 = arith.constant 1 : i32
    %21 = tpu.dynamic_rotate %1 by %c1_i32_5 dim 1 : vector<8x128xf32>, i32 -> vector<8x128xf32>
    %c2_i32_6 = arith.constant 2 : i32
    %22 = tpu.dynamic_rotate %1 by %c2_i32_6 dim 1 : vector<8x128xf32>, i32 -> vector<8x128xf32>
    %23 = vector.shape_cast %6 : vector<1x128xi1> to vector<1x128xi1>
    %24 = vector.broadcast %23 : vector<1x128xi1> to vector<8x128xi1>
    %25 = arith.select %24, %21, %22 : vector<8x128xi1>, vector<8x128xf32>
    %26 = vector.shape_cast %10 : vector<1x128xi1> to vector<1x128xi1>
    %27 = vector.broadcast %26 : vector<1x128xi1> to vector<8x128xi1>
    %28 = arith.select %27, %20, %25 : vector<8x128xi1>, vector<8x128xf32>
    %cst = arith.constant 4.000000e+00 : f32
    %29 = vector.broadcast %cst : f32 to vector<8x128xf32>
    %30 = arith.mulf %28, %29 : vector<8x128xf32>
    %cst_7 = arith.constant 5.000000e-01 : f32
    %31 = vector.broadcast %cst_7 : f32 to vector<8x128xf32>
    %32 = arith.addf %30, %31 : vector<8x128xf32>
    %33 = arith.mulf %0, %32 : vector<8x128xf32>
    %cst_8 = arith.constant 1.000000e+00 : f32
    %34 = vector.broadcast %cst_8 : f32 to vector<8x128xf32>
    %35 = arith.subf %34, %32 : vector<8x128xf32>
    %36 = arith.mulf %15, %35 : vector<8x128xf32>
    %37 = arith.addf %33, %36 : vector<8x128xf32>
    %c0_9 = arith.constant 0 : index
    %c0_10 = arith.constant 0 : index
    %38 = vector.load %arg3[%c0_9, %c0_10] : memref<8x128xf32, #tpu.memory_space<vmem>>, vector<8x128xf32>
    tpu.vector_store %arg3[%c0_9, %c0_10], %37 {strides = array<i32>} : memref<8x128xf32, #tpu.memory_space<vmem>>, vector<8x128xf32>,
    return
  }
  func.func @transform_0(%arg0: i32) -> (i32, i32) {
    %c0_i32 = arith.constant 0 : i32
    %c0_i32_0 = arith.constant 0 : i32
    return %arg0, %c0_i32 : i32, i32
  }
  func.func @transform_1(%arg0: i32) -> (i32, i32) {
    %c0_i32 = arith.constant 0 : i32
    %c0_i32_0 = arith.constant 0 : i32
    return %arg0, %c0_i32 : i32, i32
  }
  func.func @transform_2(%arg0: i32) -> (i32, i32) {
    %c0_i32 = arith.constant 0 : i32
    %c0_i32_0 = arith.constant 0 : i32
    return %arg0, %c0_i32 : i32, i32
  }
}

</mosaic_0001>

<bundles_post_ra>
// kernel: tpu_custom_call.1
= control target key start
LH: loop header
LB: loop body
LE: loop exit
PB: predicated region body
PF: predicated region fallthrough
CT: control target
= control target key end

     0   :  { %7 = vsyncpa [#allocation3], 0  ;;  %s191_s0 = inlined_call_operand.hbm [shape: f32[8,128], index: 0, kind: input, shape index: {}]   ;;  %s192_s1 = inlined_call_operand.hbm [shape: f32[8,128], index: 1, kind: input, shape index: {}]   ;;  %s193_s2 = inlined_call_operand.hbm [shape: f32[8,128], index: 2, kind: output, shape index: {}]  }
   0x1   :  { %8 = vsyncpa [#allocation6], 0 }
   0x2   :  { %9 = vsyncpa [#allocation4], 0  ;;  %s160_s9 = smov [#allocation2]   ;;  %s161_s11 = smov [#allocation5]  }
   0x3   :  { %s16_s10 = sshll.u32 %s160_s9, 4  ;;  %s26_s12 = sshll.u32 %s161_s11, 4  ;;  %s17_s10 = int_to_ptr.vmem [resolvable:$true] %s16_s10  ;;  %s27_s12 = int_to_ptr.vmem [resolvable:$true] %s26_s12 }
   0x4   :  { %s102_s13 = scalar_lea.vmem %s17_s10, 128  ;;  %p107_p1 = scmp.lt.s32.totalorder %s17_s10, %s17_s10 }
   0x5   :  { %p103_p0 = scmp.ne.s32.totalorder %s17_s10, %s102_s13  ;;  %p108_p2 = scmp.lt.s32.totalorder %s102_s13, %s102_s13 }
   0x7   :  { %p109_p3 = por %p108_p2, %p107_p1 }
   0x9   :  { %p110_p4 = pnand %p109_p3, %p103_p0 }
   0xb   :  { %113 = shalt.err (!%p110_p4)
}
   0xc   :  { %19 = dma.hbm_to_vmem [thread:$0]  %s191_s0, 128, %s17_s10, [#allocation3]  }
   0xd   :  { %s122_s16 = scalar_lea.vmem %s27_s12, 128  ;;  %p127_p6 = scmp.lt.s32.totalorder %s27_s12, %s27_s12 }
   0xe   :  { %p123_p5 = scmp.ne.s32.totalorder %s27_s12, %s122_s16  ;;  %p128_p7 = scmp.lt.s32.totalorder %s122_s16, %s122_s16 }
  0x10   :  { %p129_p8 = por %p128_p7, %p127_p6 }
  0x12   :  { %p130_p9 = pnand %p129_p8, %p123_p5 }
  0x14   :  { %133 = shalt.err (!%p130_p9)
}
  0x15   :  { %29 = dma.hbm_to_vmem [thread:$0]  %s192_s1, 128, %s27_s12, [#allocation6]  }
  0x16   :  { %154 = dma.done.wait [#allocation3], 128  }
  0x17   :  { %155 = vsyncadd [#allocation3], 4294967168 }
  0x18   :  { %156 = dma.done.wait [#allocation6], 128  }
  0x19   :  { %157 = vsyncadd [#allocation6], 4294967168  ;;  %v37_v0 = vld [vmem:[#allocation5] sm:$0xff]  ;;  %s162_s19 = smov 1   ;;  %s163_s20 = smov 126   ;;  %v36_v1 = vld [vmem:[#allocation2] sm:$0xff]  ;;  %v38_v2 = vlaneseq }
  0x1a   :  { %56 = vrot.lane.b32.xlu1 %v37_v0, %s162_s19  ;;  %51 = vrot.lane.b32.xlu0 %v37_v0, %s163_s20  ;;  %s164_s0 = smov 2   ;;  %s165_s21 = smov 127  }
  0x1b   :  { %v39_v3 = vand.u32 127, %v38_v2  ;;  %s166_s1 = smov [#allocation7]  }
  0x1c   :  { %s77_s22 = sshll.u32 %s166_s1, 4  ;;  %s78_s22 = int_to_ptr.vmem [resolvable:$true] %s77_s22 }
  0x1d   :  { %v40_v4 = vand.u32 3, %v39_v3  ;;  %s134_s23 = scalar_lea.vmem %s78_s22, 128  ;;  %p139_p11 = scmp.lt.s32.totalorder %s78_s22, %s78_s22 }
  0x1e   :  { %58 = vrot.lane.b32.xlu1 %v37_v0, %s164_s0  ;;  %53 = vrot.lane.b32.xlu0 %v37_v0, %s165_s21  ;;  %p135_p10 = scmp.ne.s32.totalorder %s78_s22, %s134_s23  ;;  %p140_p12 = scmp.lt.s32.totalorder %s134_s23, %s134_s23 }
  0x1f   :  { %v42_v5 = vand.u32 1, %v40_v4  ;;  %vm41_vm0 = vcmp.lt.s32.totalorder %v40_v4, 2 }
  0x20   :  { %p141_p13 = por %p140_p12, %p139_p11 }
  0x21   :  { %vm43_vm1 = vcmp.eq.s32.totalorder %v42_v5, 0 }
  0x22   :  { %46 = vrot.lane.b32.xlu1 %v36_v1, %s164_s0  ;;  %44 = vrot.lane.b32.xlu0 %v36_v1, %s163_s20  ;;  %p142_p0 = pnand %p141_p13, %p135_p10 }
  0x8c   :  { %v57_v6 = vpop.permute.xlu1 %56  ;;  %v52_v7 = vpop.permute.xlu0 %51 }
  0x90   :  { %v59_v8 = vpop.permute.xlu1 %58  ;;  %v54_v9 = vpop.permute.xlu0 %53 }
  0x91   :  { %v60_v10 = vsel %vm41_vm0, %v57_v6, %v59_v8  ;;  %v55_v11 = vsel %vm41_vm0, %v52_v7, %v54_v9 }
  0x92   :  { %v63_v12 = vsel %vm43_vm1, %v55_v11, %v60_v10 }
  0x93   :  { %v64_v13 = vmul.f32 4.0, %v63_v12 }
  0x94   :  { %v47_v14 = vpop.permute.xlu1 %46  ;;  %v45_v15 = vpop.permute.xlu0 %44 }
  0x95   :  { %v65_v16 = vadd.f32 0.5, %v64_v13  ;;  %v50_v17 = vsel %vm41_vm0, %v45_v15, %v47_v14 }
  0x97   :  { %v67_v18 = vsub.f32 1.0, %v65_v16  ;;  %v66_v20 = vmul.f32 %v65_v16, %v36_v1 }
  0x99   :  { %v68_v19 = vmul.f32 %v67_v18, %v50_v17 }
  0x9b   :  { %v69_v21 = vadd.f32 %v68_v19, %v66_v20 }
  0x9d   :  { %70 = vst [vmem:[#allocation7] sm:$0xff] %v69_v21 }
  0x9e   :  { %145 = shalt.err (!%p142_p0)
}
  0x9f   :  { %80 = dma.vmem_to_hbm [thread:$0]  %s78_s22, 128, %s193_s2, [#allocation4]  }
  0xa0   :  { %158 = dma.done.wait [#allocation4], 128  }
  0xa1   :  { %159 = vsyncadd [#allocation4], 4294967168 }
  0xa2   :  { %84 = vsyncpa [#allocation3], 1 }
  0xa3   :  { %85 = vsyncpa [#allocation6], 1 }
  0xa4   :  { %86 = vsyncpa [#allocation4], 1 }

</bundles_post_ra>
